<compile_context>
chip_gen: v5e
topology: v5e:2x2
jax: 0.10.0
libtpu: 0.0.40
codegen_flags: <defaults>
</compile_context>

<pallas_src>
import math
from functools import partial

import jax
import jax.numpy as jnp
from jax.experimental import pallas as pl
from jax.experimental.pallas import tpu as pltpu


def _critic_kernel(x_ref,           # (D_in, T)   compute dtype (bf16)
                   w1_ref, b1_ref,  # (H, D_in) bf16 , (H, 1) f32
                   w2_ref, b2_ref,  # (H, H)    bf16 , (H, 1) f32
                   w3_ref, b3_ref,  # (H, H)    bf16 , (H, 1) f32
                   w4_ref,          # (H, 1)    f32
                   b4_ref,          # (1,)      f32 (SMEM scalar)
                   q_ref):          # (1, T)    f32  (lane-dense output row)
    cdt = x_ref.dtype

    h = jnp.dot(w1_ref[...], x_ref[...],
                preferred_element_type=jnp.float32) + b1_ref[...]
    h = jnp.maximum(h, 0.0)

    h = jnp.dot(w2_ref[...], h.astype(cdt),
                preferred_element_type=jnp.float32) + b2_ref[...]
    h = jnp.maximum(h, 0.0)

    h = jnp.dot(w3_ref[...], h.astype(cdt),
                preferred_element_type=jnp.float32) + b3_ref[...]
    h = jnp.maximum(h, 0.0)

    # Final H -> 1 projection on the VPU/XLU (avoids an N=1 MXU matmul) and
    # lands directly in the lane-dense (1, T) output row.
    q = jnp.sum(h * w4_ref[...], axis=0, keepdims=True) + b4_ref[0]
    q_ref[...] = q.astype(q_ref.dtype)


def _num_tensorcores():
    """2 TensorCores per chip on v7x-class devices, else 1 (v5e/v6e)."""
    try:
        kind = jax.devices()[0].device_kind.lower()
    except Exception:
        return 1
    return 2 if ("v7" in kind or "7x" in kind) else 1


def _round_up(x, m):
    return ((x + m - 1) // m) * m


def _pick_batch_tile(batch, n_cores):
    """Per-core batch share rounded to a 256-lane multiple, capped at 1024.

    On 1-TC chips this collapses the grid to one step for typical batches
    (each extra step is ~0.35 us of fixed overhead); on v7x (2 TCs) it gives
    an even 2-way split so both cores get work.  The cap keeps the (H, T) f32
    activation chain within the 64-vreg file (vregs, not VMEM, are the limit).
    """
    per_core = pl.cdiv(batch, n_cores)
    return max(256, min(_round_up(per_core, 256), 1024))


@partial(jax.jit, static_argnames=("batch_tile", "compute_dtype"))
def _maddpg_critic_q(state_list, action_list, params, max_action,
                     batch_tile, compute_dtype):
    (w1, b1), (w2, b2), (w3, b3), (w4, b4) = params

    # Build x already transposed ([features, batch]): batch sits on the TPU
    # lane (minor) axis and there is no standalone HBM transpose pass.
    x_t = jnp.concatenate([s.T for s in state_list]
                          + [a.T for a in action_list], axis=0)
    x_t = x_t.astype(jnp.float32)

    d_in, B = x_t.shape
    H = w1.shape[0]
    n_obs = sum(s.shape[1] for s in state_list)

    # Fold 1/max_action into the action columns of W1 (in f32, then cast) so
    # no separate elementwise pass over the actions is needed.
    col_scale = jnp.concatenate(
        [jnp.ones((n_obs,), jnp.float32),
         jnp.full((d_in - n_obs,), 1.0, jnp.float32) / max_action])
    w1f = (w1.astype(jnp.float32) * col_scale[None, :]).astype(compute_dtype)
    w2f = w2.astype(compute_dtype)
    w3f = w3.astype(compute_dtype)
    w4c = w4.astype(jnp.float32).reshape(H, 1)    # column for the VPU reduce
    b1c = b1.astype(jnp.float32).reshape(H, 1)
    b2c = b2.astype(jnp.float32).reshape(H, 1)
    b3c = b3.astype(jnp.float32).reshape(H, 1)
    b4s = b4.astype(jnp.float32).reshape(1)       # SMEM scalar

    # Pad the batch (lane) axis to a multiple of batch_tile.
    num_tiles = pl.cdiv(B, batch_tile)
    b_pad = num_tiles * batch_tile
    if b_pad != B:
        x_t = jnp.pad(x_t, ((0, 0), (0, b_pad - B)))
    x_t = x_t.astype(compute_dtype)

    const = lambda i: (0, 0)

    bytes_per = jnp.dtype(compute_dtype).itemsize
    cost = pl.CostEstimate(
        flops=2 * b_pad * (d_in * H + 2 * H * H + H),
        transcendentals=0,
        bytes_accessed=(b_pad * d_in * bytes_per              # x
                        + (d_in * H + 2 * H * H) * bytes_per  # W1..W3
                        + (4 * H + 1) * 4                     # biases + w4
                        + b_pad * 4))                         # q out

    q_row = pl.pallas_call(
        _critic_kernel,
        out_shape=jax.ShapeDtypeStruct((1, b_pad), jnp.float32),
        grid_spec=pl.GridSpec(
            grid=(num_tiles,),
            in_specs=[
                pl.BlockSpec((d_in, batch_tile), lambda i: (0, i)),  # x tile
                # Constant-index weight/bias blocks: kept resident across grid
                # steps (block index never changes -> no re-DMA).
                pl.BlockSpec((H, d_in), const), pl.BlockSpec((H, 1), const),
                pl.BlockSpec((H, H),    const), pl.BlockSpec((H, 1), const),
                pl.BlockSpec((H, H),    const), pl.BlockSpec((H, 1), const),
                pl.BlockSpec((H, 1),    const),
                pl.BlockSpec(memory_space=pltpu.MemorySpace.SMEM),   # b4
            ],
            out_specs=pl.BlockSpec((1, batch_tile), lambda i: (0, i)),
        ),
        compiler_params=pltpu.CompilerParams(
            dimension_semantics=("parallel",)),
        cost_estimate=cost,
    )(x_t, w1f, b1c, w2f, b2c, w3f, b3c, w4c, b4s)

    return q_row[0, :B].reshape(B, 1)


def maddpg_critic_forward(state_list, action_list, params, max_action,
                          hidden_state=None, *, batch_tile=None,
                          compute_dtype=jnp.bfloat16):
    """Mirrors MADDPGCritic.forward.

    state_list  : list of [B, obs_i] arrays
    action_list : list of [B, act_i] arrays
    params      : [(W1,b1),...,(W4,b4)] in PyTorch layout (W: [out,in], b: [out])
    Returns (q [B, 1], hidden_state).
    """
    if batch_tile is None:
        batch_tile = _pick_batch_tile(state_list[0].shape[0],
                                      _num_tensorcores())
    q = _maddpg_critic_q(tuple(state_list), tuple(action_list), tuple(params),
                         jnp.float32(max_action), batch_tile, compute_dtype)
    return q, hidden_state


def init_params(key, d_in, hidden):
    """nn.Linear-style init (uniform +/- 1/sqrt(fan_in)), PyTorch layout."""
    dims = [(d_in, hidden), (hidden, hidden), (hidden, hidden), (hidden, 1)]
    params = []
    for fin, fout in dims:
        key, kw, kb = jax.random.split(key, 3)
        bound = 1.0 / math.sqrt(fin)
        w = jax.random.uniform(kw, (fout, fin), jnp.float32, -bound, bound)
        b = jax.random.uniform(kb, (fout,), jnp.float32, -bound, bound)
        params.append((w, b))
    return params


def reference_forward_f32(state_list, action_list, params, max_action):
    """Exact PyTorch-module semantics, all f32."""
    state = jnp.concatenate(state_list, axis=1)
    action = jnp.concatenate([a / max_action for a in action_list], axis=1)
    x = jnp.concatenate([state, action], axis=1).astype(jnp.float32)
    (w1, b1), (w2, b2), (w3, b3), (w4, b4) = params
    h = jnp.maximum(x @ w1.T + b1, 0.0)
    h = jnp.maximum(h @ w2.T + b2, 0.0)
    h = jnp.maximum(h @ w3.T + b3, 0.0)
    return h @ w4.T + b4


def reference_forward_matched(state_list, action_list, params, max_action,
                              compute_dtype=jnp.bfloat16):
    """Mirrors the kernel's numerics: bf16 matmul inputs, f32 accumulation,
    action scale folded into W1."""
    state = jnp.concatenate(state_list, axis=1)
    action = jnp.concatenate(action_list, axis=1)
    x = jnp.concatenate([state, action], axis=1).astype(jnp.float32)
    (w1, b1), (w2, b2), (w3, b3), (w4, b4) = params
    n_obs = state.shape[1]
    d_in = x.shape[1]
    col_scale = jnp.concatenate(
        [jnp.ones((n_obs,), jnp.float32),
         jnp.full((d_in - n_obs,), 1.0 / max_action, jnp.float32)])
    w1f = (w1 * col_scale[None, :]).astype(compute_dtype)
    h = jnp.dot(x.astype(compute_dtype), w1f.T,
                preferred_element_type=jnp.float32) + b1
    h = jnp.maximum(h, 0.0)
    h = jnp.dot(h.astype(compute_dtype), w2.astype(compute_dtype).T,
                preferred_element_type=jnp.float32) + b2
    h = jnp.maximum(h, 0.0)
    h = jnp.dot(h.astype(compute_dtype), w3.astype(compute_dtype).T,
                preferred_element_type=jnp.float32) + b3
    h = jnp.maximum(h, 0.0)
    return h @ w4.T + b4


if __name__ == "__main__":
    # Config consistent with the module:
    #   3 agents, obs_shape = [10, 10, 10], action_shape = [4, 4, 4]
    #   rnn_hidden_dim = 32, high_action (max_action) = 2.0
    # batch = 300 deliberately not a multiple of the tile (exercises padding);
    # on v5e/v6e this runs as a single 512-lane grid step, on v7x as 2x256.
    n_agents = 3
    obs_shape = [10, 10, 10]
    action_shape = [4, 4, 4]
    hidden = 32
    max_action = 2.0
    batch = 300

    d_in = sum(obs_shape) + sum(action_shape)

    key = jax.random.PRNGKey(0)
    key, kp = jax.random.split(key)
    params = init_params(kp, d_in, hidden)

    state_list, action_list = [], []
    for i in range(n_agents):
        key, ks, ka = jax.random.split(key, 3)
        state_list.append(jax.random.normal(ks, (batch, obs_shape[i]), jnp.float32))
        action_list.append(jax.random.normal(ka, (batch, action_shape[i]), jnp.float32))

    q, h_out = maddpg_critic_forward(state_list, action_list, params, max_action,
                                     hidden_state=None)
    q = jax.block_until_ready(q)
    assert q.shape == (batch, 1)
    assert h_out is None

    # Tight check vs a reference that mirrors the kernel's bf16/f32 numerics.
    q_matched = reference_forward_matched(state_list, action_list, params, max_action)
    assert jnp.allclose(q, q_matched, atol=2e-3, rtol=2e-3), \
        "mismatch vs bf16-matched reference"

    # Loose check vs the exact f32 PyTorch-module semantics (bf16 matmul inputs
    # introduce ~1e-3-level differences).
    q_f32 = reference_forward_f32(state_list, action_list, params, max_action)
    assert jnp.allclose(q, q_f32, atol=5e-2, rtol=5e-2), "mismatch vs f32 reference"

    print("KERNEL_OK")
</pallas_src>

<mosaic_0001>
module attributes {stable_mosaic.version = 11 : i64} {
  func.func @_critic_kernel(%arg0: i32, %arg1: memref<42x512xbf16, #tpu.memory_space<vmem>>, %arg2: memref<32x42xbf16, #tpu.memory_space<vmem>>, %arg3: memref<32x1xf32, #tpu.memory_space<vmem>>, %arg4: memref<32x32xbf16, #tpu.memory_space<vmem>>, %arg5: memref<32x1xf32, #tpu.memory_space<vmem>>, %arg6: memref<32x32xbf16, #tpu.memory_space<vmem>>, %arg7: memref<32x1xf32, #tpu.memory_space<vmem>>, %arg8: memref<32x1xf32, #tpu.memory_space<vmem>>, %arg9: memref<1xf32, #tpu.memory_space<smem>>, %arg10: memref<1x512xf32, #tpu.memory_space<vmem>>) attributes {dimension_semantics = [#tpu.dimension_semantics<parallel>], iteration_bounds = array<i64: 1>, scalar_prefetch = 0 : i64, scratch_operands = 0 : i64, tpu.core_type = #tpu.core_type<tc>, window_params = [{transform_indices = @transform_0, window_bounds = array<i64: 42, 512>}, {pipeline_mode = #tpu.pipeline_mode<synchronous>, transform_indices = @transform_1, window_bounds = array<i64: 32, 42>}, {pipeline_mode = #tpu.pipeline_mode<synchronous>, transform_indices = @transform_2, window_bounds = array<i64: 32, 1>}, {pipeline_mode = #tpu.pipeline_mode<synchronous>, transform_indices = @transform_3, window_bounds = array<i64: 32, 32>}, {pipeline_mode = #tpu.pipeline_mode<synchronous>, transform_indices = @transform_4, window_bounds = array<i64: 32, 1>}, {pipeline_mode = #tpu.pipeline_mode<synchronous>, transform_indices = @transform_5, window_bounds = array<i64: 32, 32>}, {pipeline_mode = #tpu.pipeline_mode<synchronous>, transform_indices = @transform_6, window_bounds = array<i64: 32, 1>}, {pipeline_mode = #tpu.pipeline_mode<synchronous>, transform_indices = @transform_7, window_bounds = array<i64: 32, 1>}, {transform_indices = @transform_8, window_bounds = array<i64: 1>}, {transform_indices = @transform_9, window_bounds = array<i64: 1, 512>}]} {
    %c0 = arith.constant 0 : index
    %c0_0 = arith.constant 0 : index
    %0 = vector.load %arg2[%c0, %c0_0] : memref<32x42xbf16, #tpu.memory_space<vmem>>, vector<32x42xbf16>
    %c0_1 = arith.constant 0 : index
    %c0_2 = arith.constant 0 : index
    %1 = vector.load %arg1[%c0_1, %c0_2] : memref<42x512xbf16, #tpu.memory_space<vmem>>, vector<42x512xbf16>
    %cst = arith.constant dense<0.000000e+00> : vector<32x512xf32>
    %2 = tpu.matmul %0, %1, %cst {dimension_numbers = #tpu.dot_dimension_numbers<[1], [0], [0], [1], [0, 0, 1, 1], [], []>} : vector<32x42xbf16>, vector<42x512xbf16>, vector<32x512xf32> -> vector<32x512xf32>
    %c0_3 = arith.constant 0 : index
    %c0_4 = arith.constant 0 : index
    %3 = vector.load %arg3[%c0_3, %c0_4] : memref<32x1xf32, #tpu.memory_space<vmem>>, vector<32x1xf32>
    %4 = vector.broadcast %3 : vector<32x1xf32> to vector<32x512xf32>
    %5 = arith.addf %2, %4 : vector<32x512xf32>
    %cst_5 = arith.constant 0.000000e+00 : f32
    %6 = vector.broadcast %cst_5 : f32 to vector<32x512xf32>
    %7 = arith.maximumf %5, %6 : vector<32x512xf32>
    %c0_6 = arith.constant 0 : index
    %c0_7 = arith.constant 0 : index
    %8 = vector.load %arg4[%c0_6, %c0_7] : memref<32x32xbf16, #tpu.memory_space<vmem>>, vector<32x32xbf16>
    %9 = arith.truncf %7 : vector<32x512xf32> to vector<32x512xbf16>
    %cst_8 = arith.constant dense<0.000000e+00> : vector<32x512xf32>
    %10 = tpu.matmul %8, %9, %cst_8 {dimension_numbers = #tpu.dot_dimension_numbers<[1], [0], [0], [1], [0, 0, 1, 1], [], []>} : vector<32x32xbf16>, vector<32x512xbf16>, vector<32x512xf32> -> vector<32x512xf32>
    %c0_9 = arith.constant 0 : index
    %c0_10 = arith.constant 0 : index
    %11 = vector.load %arg5[%c0_9, %c0_10] : memref<32x1xf32, #tpu.memory_space<vmem>>, vector<32x1xf32>
    %12 = vector.broadcast %11 : vector<32x1xf32> to vector<32x512xf32>
    %13 = arith.addf %10, %12 : vector<32x512xf32>
    %cst_11 = arith.constant 0.000000e+00 : f32
    %14 = vector.broadcast %cst_11 : f32 to vector<32x512xf32>
    %15 = arith.maximumf %13, %14 : vector<32x512xf32>
    %c0_12 = arith.constant 0 : index
    %c0_13 = arith.constant 0 : index
    %16 = vector.load %arg6[%c0_12, %c0_13] : memref<32x32xbf16, #tpu.memory_space<vmem>>, vector<32x32xbf16>
    %17 = arith.truncf %15 : vector<32x512xf32> to vector<32x512xbf16>
    %cst_14 = arith.constant dense<0.000000e+00> : vector<32x512xf32>
    %18 = tpu.matmul %16, %17, %cst_14 {dimension_numbers = #tpu.dot_dimension_numbers<[1], [0], [0], [1], [0, 0, 1, 1], [], []>} : vector<32x32xbf16>, vector<32x512xbf16>, vector<32x512xf32> -> vector<32x512xf32>
    %c0_15 = arith.constant 0 : index
    %c0_16 = arith.constant 0 : index
    %19 = vector.load %arg7[%c0_15, %c0_16] : memref<32x1xf32, #tpu.memory_space<vmem>>, vector<32x1xf32>
    %20 = vector.broadcast %19 : vector<32x1xf32> to vector<32x512xf32>
    %21 = arith.addf %18, %20 : vector<32x512xf32>
    %cst_17 = arith.constant 0.000000e+00 : f32
    %22 = vector.broadcast %cst_17 : f32 to vector<32x512xf32>
    %23 = arith.maximumf %21, %22 : vector<32x512xf32>
    %c0_18 = arith.constant 0 : index
    %c0_19 = arith.constant 0 : index
    %24 = vector.load %arg8[%c0_18, %c0_19] : memref<32x1xf32, #tpu.memory_space<vmem>>, vector<32x1xf32>
    %25 = vector.broadcast %24 : vector<32x1xf32> to vector<32x512xf32>
    %26 = arith.mulf %23, %25 : vector<32x512xf32>
    %cst_20 = arith.constant dense<0.000000e+00> : vector<512xf32>
    %27 = vector.multi_reduction <add>, %26, %cst_20 [0] : vector<32x512xf32> to vector<512xf32>
    %28 = vector.shape_cast %27 : vector<512xf32> to vector<1x512xf32>
    %c0_21 = arith.constant 0 : index
    %29 = memref.load %arg9[%c0_21] : memref<1xf32, #tpu.memory_space<smem>>
    %30 = vector.broadcast %29 : f32 to vector<1x512xf32>
    %31 = arith.addf %28, %30 : vector<1x512xf32>
    %c0_22 = arith.constant 0 : index
    %c0_23 = arith.constant 0 : index
    %32 = vector.load %arg10[%c0_22, %c0_23] : memref<1x512xf32, #tpu.memory_space<vmem>>, vector<1x512xf32>
    tpu.vector_store %arg10[%c0_22, %c0_23], %31 {strides = array<i32>} : memref<1x512xf32, #tpu.memory_space<vmem>>, vector<1x512xf32>,
    return
  }
  func.func @transform_0(%arg0: i32) -> (i32, i32) {
    %c0_i32 = arith.constant 0 : i32
    %c0_i32_0 = arith.constant 0 : i32
    return %c0_i32, %arg0 : i32, i32
  }
  func.func @transform_1(%arg0: i32) -> (i32, i32) {
    %c0_i32 = arith.constant 0 : i32
    %c0_i32_0 = arith.constant 0 : i32
    %c0_i32_1 = arith.constant 0 : i32
    return %c0_i32, %c0_i32_0 : i32, i32
  }
  func.func @transform_2(%arg0: i32) -> (i32, i32) {
    %c0_i32 = arith.constant 0 : i32
    %c0_i32_0 = arith.constant 0 : i32
    %c0_i32_1 = arith.constant 0 : i32
    return %c0_i32, %c0_i32_0 : i32, i32
  }
  func.func @transform_3(%arg0: i32) -> (i32, i32) {
    %c0_i32 = arith.constant 0 : i32
    %c0_i32_0 = arith.constant 0 : i32
    %c0_i32_1 = arith.constant 0 : i32
    return %c0_i32, %c0_i32_0 : i32, i32
  }
  func.func @transform_4(%arg0: i32) -> (i32, i32) {
    %c0_i32 = arith.constant 0 : i32
    %c0_i32_0 = arith.constant 0 : i32
    %c0_i32_1 = arith.constant 0 : i32
    return %c0_i32, %c0_i32_0 : i32, i32
  }
  func.func @transform_5(%arg0: i32) -> (i32, i32) {
    %c0_i32 = arith.constant 0 : i32
    %c0_i32_0 = arith.constant 0 : i32
    %c0_i32_1 = arith.constant 0 : i32
    return %c0_i32, %c0_i32_0 : i32, i32
  }
  func.func @transform_6(%arg0: i32) -> (i32, i32) {
    %c0_i32 = arith.constant 0 : i32
    %c0_i32_0 = arith.constant 0 : i32
    %c0_i32_1 = arith.constant 0 : i32
    return %c0_i32, %c0_i32_0 : i32, i32
  }
  func.func @transform_7(%arg0: i32) -> (i32, i32) {
    %c0_i32 = arith.constant 0 : i32
    %c0_i32_0 = arith.constant 0 : i32
    %c0_i32_1 = arith.constant 0 : i32
    return %c0_i32, %c0_i32_0 : i32, i32
  }
  func.func @transform_8(%arg0: i32) -> i32 {
    %c0_i32 = arith.constant 0 : i32
    %c0_i32_0 = arith.constant 0 : i32
    return %c0_i32 : i32
  }
  func.func @transform_9(%arg0: i32) -> (i32, i32) {
    %c0_i32 = arith.constant 0 : i32
    %c0_i32_0 = arith.constant 0 : i32
    return %c0_i32, %arg0 : i32, i32
  }
}

</mosaic_0001>

<bundles_post_ra>
// kernel: _maddpg_critic_q.1
= control target key start
LH: loop header
LB: loop body
LE: loop exit
PB: predicated region body
PF: predicated region fallthrough
CT: control target
= control target key end

     0   :  { %vm147_vm0 = vcmask 1044480   ;;  %v764_v3 = vmov 0   ;;  %vm140_vm1 = vcmask 343040   ;;  %vm298_vm2 = vcmask 261120   ;;  %s999_s0 = inlined_call_operand.vmem [shape: bf16[42,512], index: 0, kind: input, shape index: {}]   ;;  %s1000_s2 = inlined_call_operand.vmem [shape: f32[32,1], index: 2, kind: input, shape index: {}]   ;;  %s1001_s1 = inlined_call_operand.vmem [shape: bf16[32,42], index: 1, kind: input, shape index: {}]   ;;  %s1002_s4 = inlined_call_operand.vmem [shape: f32[32,1], index: 4, kind: input, shape index: {}]   ;;  %s1003_s6 = inlined_call_operand.vmem [shape: f32[32,1], index: 6, kind: input, shape index: {}]   ;;  %s1004_s7 = inlined_call_operand.vmem [shape: f32[32,1], index: 7, kind: input, shape index: {}]   ;;  %s1005_s3 = inlined_call_operand.vmem [shape: bf16[32,32], index: 3, kind: input, shape index: {}]   ;;  %s1006_s5 = inlined_call_operand.vmem [shape: bf16[32,32], index: 5, kind: input, shape index: {}]   ;;  %s1007_s8 = inlined_call_operand.<no memory space> [shape: f32[1], index: 8, kind: input, shape index: {}]   ;;  %s1008_s9 = inlined_call_operand.vmem [shape: f32[1,512], index: 9, kind: output, shape index: {}]  }
   0x1   :  { %v688_v0 = vld [vmem:[%s999_s0 + $0x40] sm:$0xf]  ;;  %v754_v1 = vld [vmem:[%s999_s0 + $0x4c] sm:$0x10]  ;;  %v752_v2 = vld [vmem:[%s999_s0 + $0x44] sm:$0xf]  ;;  %761 = vset.pattern.permute.xlu0 %v764_v3  ;;  %762 = vset.pattern.permute.xlu1 %v764_v3 }
   0x2   :  { %v689_v4 = vor.u32 %v754_v1, %v688_v0  ;;  %v690_v5 = vld [vmem:[%s999_s0 + $0x50] sm:$0x10]  ;;  %v696_v6 = vld [vmem:[%s999_s0 + $0x48] sm:$0xf]  ;;  %v755_v7 = vld [vmem:[%s999_s0 + $0x54] sm:$0x10]  ;;  %763 = vset.pattern.permute.xlu2 %v764_v3 }
   0x3   :  { %v693_v8 = vor.u32 %v752_v2, %v690_v5  ;;  %v697_v9 = vor.u32 %v755_v7, %v696_v6  ;;  %v753_v10 = vld [vmem:[%s999_s0 + $0x4c] sm:$0xf]  ;;  %v698_v11 = vld [vmem:[%s999_s0 + $0x58] sm:$0x10]  ;;  %v52_v12 = vld [vmem:[%s1000_s2 + $0x10] sm:$0xff]  ;;  %vm630_vm3 = vcmask 1040384  }
   0x4   :  { %v149_v13 = vsel %vm147_vm0, %v689_v4, 0  ;;  %v701_v14 = vor.u32 %v753_v10, %v698_v11  ;;  %66 = vperm.xlu0 %761, %v52_v12   ;;  %v672_v15 = vld [vmem:[%s999_s0 + $0x20] sm:$0xf]  ;;  %v750_v16 = vld [vmem:[%s999_s0 + $0x2c] sm:$0xf0]  ;;  %v53_v30 = vld [vmem:[%s1000_s2 + $0x18] sm:$0xff] }
   0x5   :  { %165 = vmatpush.bf16.msra.mxu0 %v149_v13  ;;  %v152_v17 = vsel %vm147_vm0, %v693_v8, 0  ;;  %v155_v18 = vsel %vm147_vm0, %v697_v9, 0  ;;  %v673_v19 = vor.u32 %v750_v16, %v672_v15  ;;  %v748_v20 = vld [vmem:[%s999_s0 + $0x24] sm:$0xf]  ;;  %v674_v21 = vld [vmem:[%s999_s0 + $0x30] sm:$0xf0] }
   0x6   :  { %184 = vmatpush.bf16.msra.mxu1 %v152_v17  ;;  %203 = vmatpush.bf16.msra.mxu2 %v155_v18  ;;  %v158_v22 = vsel %vm147_vm0, %v701_v14, 0  ;;  %v677_v23 = vor.u32 %v748_v20, %v674_v21  ;;  %v680_v24 = vld [vmem:[%s999_s0 + $0x28] sm:$0xf]  ;;  %v751_v25 = vld [vmem:[%s999_s0 + $0x34] sm:$0xf0]  ;;  %v50_v42 = vld [vmem:[%s1000_s2] sm:$0xff] }
   0x7   :  { %222 = vmatpush.bf16.msra.mxu3 %v158_v22  ;;  %v681_v26 = vor.u32 %v751_v25, %v680_v24  ;;  %v749_v27 = vld [vmem:[%s999_s0 + $0x2c] sm:$0xf]  ;;  %v682_v28 = vld [vmem:[%s999_s0 + $0x38] sm:$0xf0]  ;;  %v656_v29 = vld [vmem:[%s999_s0] sm:$0xf]  ;;  %56 = vperm.xlu1 %762, %v50_v42  }
   0x8   :  { %v685_v31 = vor.u32 %v749_v27, %v682_v28  ;;  %v746_v32 = vld [vmem:[%s999_s0 + $0xc] sm:$0xf0]  ;;  %v744_v33 = vld [vmem:[%s999_s0 + $0x4] sm:$0xf]  ;;  %v658_v34 = vld [vmem:[%s999_s0 + $0x10] sm:$0xf0] }
   0x9   :  { %166 = vmatpush.bf16.msra.mxu0 %v673_v19  ;;  %v657_v35 = vor.u32 %v746_v32, %v656_v29  ;;  %v664_v36 = vld [vmem:[%s999_s0 + $0x8] sm:$0xf]  ;;  %v747_v37 = vld [vmem:[%s999_s0 + $0x14] sm:$0xf0]  ;;  %v745_v38 = vld [vmem:[%s999_s0 + $0xc] sm:$0xf]  ;;  %v661_v39 = vor.u32 %v744_v33, %v658_v34 }
   0xa   :  { %185 = vmatpush.bf16.msra.mxu1 %v677_v23  ;;  %204 = vmatpush.bf16.msra.mxu2 %v681_v26  ;;  %v665_v40 = vor.u32 %v747_v37, %v664_v36  ;;  %v666_v41 = vld [vmem:[%s999_s0 + $0x18] sm:$0xf0]  ;;  %v742_v44 = vld [vmem:[%s1001_s1] sm:$0xff]  ;;  %v51_v45 = vld [vmem:[%s1000_s2 + $0x8] sm:$0xff]  ;;  %vm632_vm4 = vcmask 1042434   ;;  %vm634_vm5 = vcmask 1041408  }
   0xb   :  { %223 = vmatpush.bf16.msra.mxu3 %v685_v31  ;;  %v669_v43 = vor.u32 %v745_v38, %v666_v41  ;;  %v264_v46 = vld [vmem:[%s1002_s4] sm:$0xff]  ;;  %v265_v47 = vld [vmem:[%s1002_s4 + $0x8] sm:$0xff]  ;;  %v411_v50 = vld [vmem:[%s1003_s6 + $0x10] sm:$0xff] }
   0xc   :  { %71 = vperm.xlu0 %761, %v53_v30   ;;  %v410_v48 = vld [vmem:[%s1003_s6 + $0x8] sm:$0xff]  ;;  %v541_v51 = vld [vmem:[%s1004_s7] sm:$0xff]  ;;  %v544_v53 = vld [vmem:[%s1004_s7 + $0x18] sm:$0xff] }
   0xd   :  { %167 = vmatpush.bf16.msra.mxu0 %v657_v35  ;;  %v743_v49 = vld [vmem:[%s1001_s1 + $0x8] sm:$0xff]  ;;  %v266_v27 = vld [vmem:[%s1002_s4 + $0x10] sm:$0xff] }
   0xe   :  { %186 = vmatpush.bf16.msra.mxu1 %v661_v39  ;;  %205 = vmatpush.bf16.msra.mxu2 %v665_v40  ;;  %v542_v52 = vld [vmem:[%s1004_s7 + $0x8] sm:$0xff]  ;;  %v756_v40 = vld [vmem:[%s1005_s3] sm:$0xff] }
   0xf   :  { %224 = vmatpush.bf16.msra.mxu3 %v669_v43  ;;  %61 = vperm.xlu1 %762, %v51_v45  }
  0x10   :  { %702 = vmatmul.msk.bf16.vlgmr.msra.gmra.mxu0 %vm140_vm1, %v742_v44  ;;  %280 = vperm.xlu2 %763, %v266_v27  }
  0x11   :  { %704 = vmatmul.msk.bf16.vlgmr.msra.gmra.mxu1 %vm140_vm1, %v742_v44  ;;  %706 = vmatmul.msk.bf16.vlgmr.msra.gmra.mxu2 %vm140_vm1, %v742_v44 }
  0x12   :  { %708 = vmatmul.msk.bf16.vlgmr.msra.gmra.mxu3 %vm140_vm1, %v742_v44 }
  0x14   :  { %270 = vperm.xlu0 %761, %v264_v46  }
  0x17   :  { %275 = vperm.xlu1 %762, %v265_v47  }
  0x1c   :  { %420 = vperm.xlu0 %761, %v410_v48   ;;  %v267_v48 = vld [vmem:[%s1002_s4 + $0x18] sm:$0xff] }
  0x1d   :  { %285 = vperm.xlu2 %763, %v267_v48  }
  0x1f   :  { %425 = vperm.xlu1 %762, %v411_v50  }
  0x20   :  { %703 = vmatmul.msk.bf16.gmra.mxu0 %vm140_vm1, %v743_v49 }
  0x21   :  { %705 = vmatmul.msk.bf16.gmra.mxu1 %vm140_vm1, %v743_v49  ;;  %707 = vmatmul.msk.bf16.gmra.mxu2 %vm140_vm1, %v743_v49 }
  0x22   :  { %709 = vmatmul.msk.bf16.gmra.mxu3 %vm140_vm1, %v743_v49 }
  0x24   :  { %547 = vperm.xlu0 %761, %v541_v51  }
  0x27   :  { %552 = vperm.xlu1 %762, %v542_v52  }
  0x2c   :  { %562 = vperm.xlu0 %761, %v544_v53   ;;  %v409_v53 = vld [vmem:[%s1003_s6] sm:$0xff] }
  0x2d   :  { %415 = vperm.xlu2 %763, %v409_v53  }
  0x76   :  { %v67_v60 = vpop.permute.xlu0 %66 }
  0x79   :  { %v57_v61 = vpop.permute.xlu1 %56 }
  0x7e   :  { %v72_v2 = vpop.permute.xlu0 %71 }
  0x81   :  { %v62_v3 = vpop.permute.xlu1 %61 }
  0x8d   :  { %v169_v54 = vpop.f32.mrf.mxu0 }
  0x8e   :  { %v188_v55 = vpop.f32.mrf.mxu1  ;;  %v170_v9 = vadd.f32 %v169_v54, %v57_v61  ;;  %v757_v54 = vld [vmem:[%s1005_s3 + $0x8] sm:$0xff] }
  0x8f   :  { %v189_v13 = vadd.f32 %v188_v55, %v57_v61  ;;  %v412_v55 = vld [vmem:[%s1003_s6 + $0x18] sm:$0xff] }
  0x90   :  { %v236_v20 = vmax.f32 %v170_v9, 0.0  ;;  %430 = vperm.xlu2 %763, %v412_v55  }
  0x91   :  { %v237_v23 = vmax.f32 %v189_v13, 0.0  ;;  %v271_v13 = vpop.permute.xlu0 %270 }
  0x94   :  { %v207_v56 = vpop.f32.mrf.mxu2 }
  0x95   :  { %v226_v57 = vpop.f32.mrf.mxu3  ;;  %v171_v58 = vpop.f32.mrf.mxu0  ;;  %v208_v36 = vadd.f32 %v207_v56, %v57_v61  ;;  %v543_v56 = vld [vmem:[%s1004_s7 + $0x10] sm:$0xff] }
  0x96   :  { %v190_v59 = vpop.f32.mrf.mxu1  ;;  %v172_v10 = vadd.f32 %v171_v58, %v62_v3  ;;  %v227_v41 = vadd.f32 %v226_v57, %v57_v61 }
  0x97   :  { %v191_v14 = vadd.f32 %v190_v59, %v62_v3  ;;  %v238_v49 = vmax.f32 %v208_v36, 0.0 }
  0x98   :  { %v240_v21 = vmax.f32 %v172_v10, 0.0  ;;  %v239_v50 = vmax.f32 %v227_v41, 0.0  ;;  %557 = vperm.xlu2 %763, %v543_v56  }
  0x99   :  { %v241_v24 = vmax.f32 %v191_v14, 0.0 }
  0x9a   :  { %v256_v35 = vpack.c.bf16 %v240_v21, %v236_v20 }
  0x9b   :  { %v257_v39 = vpack.c.bf16 %v241_v24, %v237_v23 }
  0x9c   :  { %v209_v62 = vpop.f32.mrf.mxu2 }
  0x9d   :  { %v228_v63 = vpop.f32.mrf.mxu3  ;;  %v174_v0 = vpop.f32.mrf.mxu0  ;;  %v210_v30 = vadd.f32 %v209_v62, %v62_v3 }
  0x9e   :  { %v193_v1 = vpop.f32.mrf.mxu1  ;;  %v175_v4 = vadd.f32 %v174_v0, %v67_v60  ;;  %v229_v33 = vadd.f32 %v228_v63, %v62_v3  ;;  %v281_v62 = vpop.permute.xlu2 %280 }
  0x9f   :  { %v194_v6 = vadd.f32 %v193_v1, %v67_v60  ;;  %v242_v44 = vmax.f32 %v210_v30, 0.0 }
  0xa0   :  { %v244_v16 = vmax.f32 %v175_v4, 0.0  ;;  %v243_v46 = vmax.f32 %v229_v33, 0.0 }
  0xa1   :  { %v245_v18 = vmax.f32 %v194_v6, 0.0  ;;  %v258_v51 = vpack.c.bf16 %v242_v44, %v238_v49  ;;  %v276_v6 = vpop.permute.xlu1 %275 }
  0xa2   :  { %v259_v52 = vpack.c.bf16 %v243_v46, %v239_v50 }
  0xa4   :  { %v212_v5 = vpop.f32.mrf.mxu2 }
  0xa5   :  { %v231_v7 = vpop.f32.mrf.mxu3  ;;  %v176_v8 = vpop.f32.mrf.mxu0  ;;  %v213_v25 = vadd.f32 %v212_v5, %v67_v60 }
  0xa6   :  { %v177_v11 = vadd.f32 %v176_v8, %v72_v2  ;;  %v195_v12 = vpop.f32.mrf.mxu1  ;;  %v232_v28 = vadd.f32 %v231_v7, %v67_v60  ;;  %v286_v7 = vpop.permute.xlu2 %285 }
  0xa7   :  { %v196_v15 = vadd.f32 %v195_v12, %v72_v2  ;;  %v246_v37 = vmax.f32 %v213_v25, 0.0 }
  0xa8   :  { %v248_v17 = vmax.f32 %v177_v11, 0.0  ;;  %v247_v42 = vmax.f32 %v232_v28, 0.0 }
  0xa9   :  { %v249_v19 = vmax.f32 %v196_v15, 0.0 }
  0xaa   :  { %v260_v22 = vpack.c.bf16 %v248_v17, %v244_v16 }
  0xab   :  { %v261_v26 = vpack.c.bf16 %v249_v19, %v245_v18 }
  0xac   :  { %v214_v29 = vpop.f32.mrf.mxu2  ;;  %311 = vmatpush.bf16.msrb.mxu0 %v260_v22 }
  0xad   :  { %v215_v31 = vadd.f32 %v214_v29, %v72_v2  ;;  %v233_v32 = vpop.f32.mrf.mxu3  ;;  %330 = vmatpush.bf16.msrb.mxu1 %v261_v26 }
  0xae   :  { %v234_v34 = vadd.f32 %v233_v32, %v72_v2 }
  0xaf   :  { %v250_v38 = vmax.f32 %v215_v31, 0.0  ;;  %v758_v31 = vld [vmem:[%s1006_s5] sm:$0xff] }
  0xb0   :  { %v251_v43 = vmax.f32 %v234_v34, 0.0  ;;  %312 = vmatpush.bf16.msrb.mxu0 %v256_v35 }
  0xb1   :  { %331 = vmatpush.bf16.msrb.mxu1 %v257_v39  ;;  %v262_v45 = vpack.c.bf16 %v250_v38, %v246_v37 }
  0xb2   :  { %v263_v47 = vpack.c.bf16 %v251_v43, %v247_v42 }
  0xb3   :  { %349 = vmatpush.bf16.msrb.mxu2 %v262_v45  ;;  %718 = vmatmul.msk.bf16.vlgmr.msrb.gmra.mxu0 %vm298_vm2, %v756_v40 }
  0xb4   :  { %368 = vmatpush.bf16.msrb.mxu3 %v263_v47  ;;  %720 = vmatmul.msk.bf16.vlgmr.msrb.gmra.mxu1 %vm298_vm2, %v756_v40 }
  0xb7   :  { %350 = vmatpush.bf16.msrb.mxu2 %v258_v51 }
  0xb8   :  { %369 = vmatpush.bf16.msrb.mxu3 %v259_v52 }
  0xba   :  { %722 = vmatmul.msk.bf16.vlgmr.msrb.gmra.mxu2 %vm298_vm2, %v756_v40 }
  0xbb   :  { %724 = vmatmul.msk.bf16.vlgmr.msrb.gmra.mxu3 %vm298_vm2, %v756_v40 }
  0xc3   :  { %719 = vmatmul.msk.bf16.gmra.mxu0 %vm298_vm2, %v757_v54 }
  0xc4   :  { %721 = vmatmul.msk.bf16.gmra.mxu1 %vm298_vm2, %v757_v54 }
  0xca   :  { %723 = vmatmul.msk.bf16.gmra.mxu2 %vm298_vm2, %v757_v54 }
  0xcb   :  { %725 = vmatmul.msk.bf16.gmra.mxu3 %vm298_vm2, %v757_v54  ;;  %v759_v54 = vld [vmem:[%s1006_s5 + $0x8] sm:$0xff] }
 0x130   :  { %v314_v57 = vpop.f32.mrf.mxu0 }
 0x131   :  { %v333_v58 = vpop.f32.mrf.mxu1  ;;  %v315_v17 = vadd.f32 %v314_v57, %v271_v13  ;;  %v416_v57 = vpop.permute.xlu2 %415 }
 0x132   :  { %v334_v19 = vadd.f32 %v333_v58, %v271_v13 }
 0x133   :  { %v381_v27 = vmax.f32 %v315_v17, 0.0 }
 0x134   :  { %v382_v28 = vmax.f32 %v334_v19, 0.0 }
 0x138   :  { %v316_v59 = vpop.f32.mrf.mxu0 }
 0x139   :  { %v335_v60 = vpop.f32.mrf.mxu1  ;;  %v317_v9 = vadd.f32 %v316_v59, %v276_v6  ;;  %v421_v59 = vpop.permute.xlu0 %420 }
 0x13a   :  { %v336_v14 = vadd.f32 %v335_v60, %v276_v6 }
 0x13b   :  { %v385_v21 = vmax.f32 %v317_v9, 0.0 }
 0x13c   :  { %v386_v24 = vmax.f32 %v336_v14, 0.0 }
 0x13d   :  { %v352_v61 = vpop.f32.mrf.mxu2  ;;  %v401_v29 = vpack.c.bf16 %v385_v21, %v381_v27 }
 0x13e   :  { %v371_v63 = vpop.f32.mrf.mxu3  ;;  %v402_v30 = vpack.c.bf16 %v386_v24, %v382_v28  ;;  %v353_v40 = vadd.f32 %v352_v61, %v271_v13  ;;  %v426_v61 = vpop.permute.xlu1 %425 }
 0x13f   :  { %v372_v43 = vadd.f32 %v371_v63, %v271_v13 }
 0x140   :  { %v319_v0 = vpop.f32.mrf.mxu0  ;;  %v383_v50 = vmax.f32 %v353_v40, 0.0 }
 0x141   :  { %v338_v1 = vpop.f32.mrf.mxu1  ;;  %v320_v2 = vadd.f32 %v319_v0, %v281_v62  ;;  %v384_v51 = vmax.f32 %v372_v43, 0.0 }
 0x142   :  { %v339_v4 = vadd.f32 %v338_v1, %v281_v62 }
 0x143   :  { %v389_v10 = vmax.f32 %v320_v2, 0.0  ;;  %v983_v2 = vpop.permute.xlu0 %547 }
 0x144   :  { %v390_v15 = vmax.f32 %v339_v4, 0.0 }
 0x145   :  { %v354_v3 = vpop.f32.mrf.mxu2 }
 0x146   :  { %v373_v5 = vpop.f32.mrf.mxu3  ;;  %v355_v35 = vadd.f32 %v354_v3, %v276_v6 }
 0x147   :  { %v374_v38 = vadd.f32 %v373_v5, %v276_v6 }
 0x148   :  { %v321_v8 = vpop.f32.mrf.mxu0  ;;  %v387_v46 = vmax.f32 %v355_v35, 0.0 }
 0x149   :  { %v322_v11 = vadd.f32 %v321_v8, %v286_v7  ;;  %v340_v12 = vpop.f32.mrf.mxu1  ;;  %v388_v48 = vmax.f32 %v374_v38, 0.0 }
 0x14a   :  { %v341_v16 = vadd.f32 %v340_v12, %v286_v7  ;;  %v403_v52 = vpack.c.bf16 %v387_v46, %v383_v50 }
 0x14b   :  { %v393_v18 = vmax.f32 %v322_v11, 0.0  ;;  %v404_v53 = vpack.c.bf16 %v388_v48, %v384_v51  ;;  %v553_v11 = vpop.permute.xlu1 %552 }
 0x14c   :  { %v394_v20 = vmax.f32 %v341_v16, 0.0 }
 0x14d   :  { %v405_v22 = vpack.c.bf16 %v393_v18, %v389_v10  ;;  %v357_v23 = vpop.f32.mrf.mxu2 }
 0x14e   :  { %v406_v25 = vpack.c.bf16 %v394_v20, %v390_v15  ;;  %v376_v26 = vpop.f32.mrf.mxu3  ;;  %v358_v32 = vadd.f32 %v357_v23, %v281_v62 }
 0x14f   :  { %455 = vmatpush.bf16.msra.mxu0 %v405_v22  ;;  %v377_v33 = vadd.f32 %v376_v26, %v281_v62  ;;  %v981_v62 = vpop.permute.xlu2 %430  ;;  %v563_v26 = vpop.permute.xlu0 %562 }
 0x150   :  { %474 = vmatpush.bf16.msra.mxu1 %v406_v25  ;;  %v391_v41 = vmax.f32 %v358_v32, 0.0 }
 0x151   :  { %v392_v44 = vmax.f32 %v377_v33, 0.0 }
 0x153   :  { %456 = vmatpush.bf16.msra.mxu0 %v401_v29 }
 0x154   :  { %475 = vmatpush.bf16.msra.mxu1 %v402_v30 }
 0x155   :  { %v359_v34 = vpop.f32.mrf.mxu2 }
 0x156   :  { %v360_v36 = vadd.f32 %v359_v34, %v286_v7  ;;  %v378_v37 = vpop.f32.mrf.mxu3  ;;  %734 = vmatmul.msk.bf16.vlgmr.msra.gmra.mxu0 %vm298_vm2, %v758_v31 }
 0x157   :  { %v379_v39 = vadd.f32 %v378_v37, %v286_v7  ;;  %736 = vmatmul.msk.bf16.vlgmr.msra.gmra.mxu1 %vm298_vm2, %v758_v31  ;;  %v558_v17 = vpop.permute.xlu2 %557 }
 0x158   :  { %v395_v42 = vmax.f32 %v360_v36, 0.0 }
 0x159   :  { %v396_v45 = vmax.f32 %v379_v39, 0.0 }
 0x15a   :  { %v407_v47 = vpack.c.bf16 %v395_v42, %v391_v41 }
 0x15b   :  { %v408_v49 = vpack.c.bf16 %v396_v45, %v392_v44 }
 0x15c   :  { %493 = vmatpush.bf16.msra.mxu2 %v407_v47 }
 0x15d   :  { %512 = vmatpush.bf16.msra.mxu3 %v408_v49 }
 0x160   :  { %494 = vmatpush.bf16.msra.mxu2 %v403_v52 }
 0x161   :  { %513 = vmatpush.bf16.msra.mxu3 %v404_v53 }
 0x163   :  { %738 = vmatmul.msk.bf16.vlgmr.msra.gmra.mxu2 %vm298_vm2, %v758_v31 }
 0x164   :  { %740 = vmatmul.msk.bf16.vlgmr.msra.gmra.mxu3 %vm298_vm2, %v758_v31 }
 0x166   :  { %735 = vmatmul.msk.bf16.gmra.mxu0 %vm298_vm2, %v759_v54 }
 0x167   :  { %737 = vmatmul.msk.bf16.gmra.mxu1 %vm298_vm2, %v759_v54 }
 0x173   :  { %739 = vmatmul.msk.bf16.gmra.mxu2 %vm298_vm2, %v759_v54 }
 0x174   :  { %741 = vmatmul.msk.bf16.gmra.mxu3 %vm298_vm2, %v759_v54 }
 0x1d3   :  { %v458_v55 = vpop.f32.mrf.mxu0 }
 0x1d4   :  { %v477_v56 = vpop.f32.mrf.mxu1  ;;  %v459_v13 = vadd.f32 %v458_v55, %v416_v57 }
 0x1d5   :  { %v478_v3 = vadd.f32 %v477_v56, %v416_v57 }
 0x1d6   :  { %v525_v27 = vmax.f32 %v459_v13, 0.0 }
 0x1d7   :  { %v526_v8 = vmax.f32 %v478_v3, 0.0 }
 0x1d8   :  { %v565_v34 = vmul.f32 %v983_v2, %v525_v27 }
 0x1d9   :  { %v566_v19 = vmul.f32 %v983_v2, %v526_v8 }
 0x1db   :  { %v460_v58 = vpop.f32.mrf.mxu0 }
 0x1dc   :  { %v479_v60 = vpop.f32.mrf.mxu1  ;;  %v461_v9 = vadd.f32 %v460_v58, %v421_v59 }
 0x1dd   :  { %v480_v0 = vadd.f32 %v479_v60, %v421_v59 }
 0x1de   :  { %v529_v20 = vmax.f32 %v461_v9, 0.0 }
 0x1df   :  { %v530_v7 = vmax.f32 %v480_v0, 0.0 }
 0x1e0   :  { %v569_v31 = vmul.f32 %v553_v11, %v529_v20 }
 0x1e1   :  { %v570_v14 = vmul.f32 %v553_v11, %v530_v7 }
 0x1e2   :  { %v581_v38 = vadd.f32 %v569_v31, %v565_v34 }
 0x1e3   :  { %v463_v63 = vpop.f32.mrf.mxu0  ;;  %v590_v28 = vadd.f32 %v570_v14, %v566_v19 }
 0x1e4   :  { %v482_v1 = vpop.f32.mrf.mxu1  ;;  %v464_v15 = vadd.f32 %v463_v63, %v426_v61 }
 0x1e5   :  { %v483_v4 = vadd.f32 %v482_v1, %v426_v61 }
 0x1e6   :  { %v496_v5 = vpop.f32.mrf.mxu2  ;;  %v533_v29 = vmax.f32 %v464_v15, 0.0 }
 0x1e7   :  { %v515_v6 = vpop.f32.mrf.mxu3  ;;  %v534_v10 = vmax.f32 %v483_v4, 0.0  ;;  %v497_v42 = vadd.f32 %v496_v5, %v416_v57 }
 0x1e8   :  { %v573_v35 = vmul.f32 %v558_v17, %v533_v29  ;;  %v516_v46 = vadd.f32 %v515_v6, %v416_v57 }
 0x1e9   :  { %v574_v21 = vmul.f32 %v558_v17, %v534_v10  ;;  %v527_v52 = vmax.f32 %v497_v42, 0.0 }
 0x1ea   :  { %v582_v45 = vadd.f32 %v581_v38, %v573_v35  ;;  %v528_v54 = vmax.f32 %v516_v46, 0.0  ;;  %v637_v38 = vlaneseq }
 0x1eb   :  { %v465_v12 = vpop.f32.mrf.mxu0  ;;  %v591_v32 = vadd.f32 %v590_v28, %v574_v21  ;;  %v567_v0 = vmul.f32 %v983_v2, %v527_v52  ;;  %v618_v28 = vstv %s1007_s8 }
 0x1ec   :  { %v484_v16 = vpop.f32.mrf.mxu1  ;;  %v466_v22 = vadd.f32 %v465_v12, %v981_v62  ;;  %vm639_vm6 = vcmp.lt.s32.totalorder %v637_v38, 512 }
 0x1ed   :  { %v485_v18 = vadd.f32 %v484_v16, %v981_v62 }
 0x1ee   :  { %v498_v23 = vpop.f32.mrf.mxu2  ;;  %v537_v33 = vmax.f32 %v466_v22, 0.0 }
 0x1ef   :  { %v538_v24 = vmax.f32 %v485_v18, 0.0  ;;  %v517_v25 = vpop.f32.mrf.mxu3  ;;  %v499_v37 = vadd.f32 %v498_v23, %v421_v59 }
 0x1f0   :  { %v577_v39 = vmul.f32 %v563_v26, %v537_v33  ;;  %v518_v40 = vadd.f32 %v517_v25, %v421_v59 }
 0x1f1   :  { %v578_v30 = vmul.f32 %v563_v26, %v538_v24  ;;  %v531_v49 = vmax.f32 %v499_v37, 0.0 }
 0x1f2   :  { %v583_v50 = vadd.f32 %v582_v45, %v577_v39  ;;  %v532_v51 = vmax.f32 %v518_v40, 0.0 }
 0x1f3   :  { %v592_v36 = vadd.f32 %v591_v32, %v578_v30  ;;  %v571_v58 = vmul.f32 %v553_v11, %v531_v49 }
 0x1f4   :  { %v584_v60 = vrot.slane %v583_v50, 4  ;;  %v572_v63 = vmul.f32 %v553_v11, %v532_v51 }
 0x1f5   :  { %v593_v47 = vrot.slane %v592_v36, 4  ;;  %v599_v7 = vadd.f32 %v571_v58, %v567_v0 }
 0x1f6   :  { %v501_v41 = vpop.f32.mrf.mxu2  ;;  %v585_v9 = vadd.f32 %v584_v60, %v583_v50 }
 0x1f7   :  { %v502_v43 = vadd.f32 %v501_v41, %v426_v61  ;;  %v520_v44 = vpop.f32.mrf.mxu3  ;;  %v594_v55 = vadd.f32 %v593_v47, %v592_v36 }
 0x1f8   :  { %v521_v48 = vadd.f32 %v520_v44, %v426_v61  ;;  %v568_v61 = vmul.f32 %v983_v2, %v528_v54  ;;  %v586_v19 = vrot.slane %v585_v9, 2 }
 0x1f9   :  { %v535_v53 = vmax.f32 %v502_v43, 0.0  ;;  %v595_v4 = vrot.slane %v594_v55, 2 }
 0x1fa   :  { %v536_v56 = vmax.f32 %v521_v48, 0.0  ;;  %v608_v10 = vadd.f32 %v572_v63, %v568_v61 }
 0x1fb   :  { %v575_v1 = vmul.f32 %v558_v17, %v535_v53  ;;  %v596_v14 = vadd.f32 %v595_v4, %v594_v55 }
 0x1fc   :  { %v576_v5 = vmul.f32 %v558_v17, %v536_v56  ;;  %v587_v17 = vadd.f32 %v586_v19, %v585_v9 }
 0x1fd   :  { %v600_v13 = vadd.f32 %v599_v7, %v575_v1  ;;  %v597_v22 = vrot.slane %v596_v14, 1 }
 0x1fe   :  { %v503_v59 = vpop.f32.mrf.mxu2  ;;  %v609_v15 = vadd.f32 %v608_v10, %v576_v5  ;;  %v588_v30 = vrot.slane %v587_v17, 1 }
 0x1ff   :  { %v504_v3 = vadd.f32 %v503_v59, %v981_v62  ;;  %v522_v57 = vpop.f32.mrf.mxu3  ;;  %v598_v25 = vadd.f32 %v597_v22, %v596_v14 }
 0x200   :  { %v523_v6 = vadd.f32 %v522_v57, %v981_v62  ;;  %v589_v35 = vadd.f32 %v588_v30, %v587_v17 }
 0x201   :  { %v539_v8 = vmax.f32 %v504_v3, 0.0  ;;  %v620_v32 = vadd.f32 %v618_v28, %v598_v25 }
 0x202   :  { %v540_v12 = vmax.f32 %v523_v6, 0.0  ;;  %v619_v42 = vadd.f32 %v618_v28, %v589_v35 }
 0x203   :  { %v579_v11 = vmul.f32 %v563_v26, %v539_v8  ;;  %v627_v39 = vrot.slane %v620_v32, 7 }
 0x204   :  { %v580_v16 = vmul.f32 %v563_v26, %v540_v12 }
 0x205   :  { %v601_v18 = vadd.f32 %v600_v13, %v579_v11  ;;  %v631_v44 = vsel %vm630_vm3, %v619_v42, %v627_v39 }
 0x206   :  { %v610_v20 = vadd.f32 %v609_v15, %v580_v16 }
 0x207   :  { %v602_v21 = vrot.slane %v601_v18, 4 }
 0x208   :  { %v611_v2 = vrot.slane %v610_v20, 4 }
 0x209   :  { %v603_v23 = vadd.f32 %v602_v21, %v601_v18 }
 0x20a   :  { %v612_v24 = vadd.f32 %v611_v2, %v610_v20 }
 0x20b   :  { %v604_v62 = vrot.slane %v603_v23, 2 }
 0x20c   :  { %v613_v27 = vrot.slane %v612_v24, 2 }
 0x20d   :  { %v605_v29 = vadd.f32 %v604_v62, %v603_v23 }
 0x20e   :  { %v614_v31 = vadd.f32 %v613_v27, %v612_v24 }
 0x20f   :  { %v606_v26 = vrot.slane %v605_v29, 1 }
 0x210   :  { %v615_v33 = vrot.slane %v614_v31, 1 }
 0x211   :  { %v607_v34 = vadd.f32 %v606_v26, %v605_v29 }
 0x212   :  { %v616_v36 = vadd.f32 %v615_v33, %v614_v31 }
 0x213   :  { %v621_v37 = vadd.f32 %v618_v28, %v607_v34 }
 0x214   :  { %v622_v40 = vadd.f32 %v618_v28, %v616_v36 }
 0x215   :  { %v628_v41 = vrot.slane %v621_v37, 6 }
 0x216   :  { %v629_v43 = vrot.slane %v622_v40, 5 }
 0x218   :  { %v633_v45 = vsel %vm632_vm4, %v628_v41, %v629_v43 }
 0x219   :  { %v635_v46 = vsel %vm634_vm5, %v631_v44, %v633_v45 }
 0x21a   :  { %641 = vst.msk [vmem:[%s1008_s9] sm:$0xf] %vm639_vm6, %v635_v46 }

</bundles_post_ra>
